<compile_context>
chip_gen: v7x
topology: tpu7x:2x2x1
jax: 0.10.0
libtpu: 0.0.40
codegen_flags: <defaults>
</compile_context>

<pallas_src>
import functools

import jax
import jax.numpy as jnp
from jax.experimental import pallas as pl
from jax.experimental.pallas import tpu as pltpu

_LANES = 128
# (4, 1024, 128) f32 tile = 2 MiB per input per step.  With default
# double-buffering: 2 inputs * 2 bufs * 2 MiB + 2 * 0.5 MiB output = ~9 MiB,
# which fits the default scoped VMEM on all of v5e (16 MiB), v6e (32 MiB) and
# v7x (32 MiB) while keeping the per-step pipeline overhead negligible
# (~128K boxes / ~2 MiB moved per input per grid step).
_MAX_ROW_BLOCK = 1024


def _iou_loss_kernel(pred_ref, targ_ref, out_ref, *, loss_type):
    # pred_ref / targ_ref: (4, TR, 128) f32, coord axis = (cx, cy, w, h)
    # out_ref: (TR, 128) f32
    p_x, p_y = pred_ref[0], pred_ref[1]
    p_w, p_h = pred_ref[2], pred_ref[3]
    t_x, t_y = targ_ref[0], targ_ref[1]
    t_w, t_h = targ_ref[2], targ_ref[3]

    p_hw, p_hh = p_w * 0.5, p_h * 0.5
    t_hw, t_hh = t_w * 0.5, t_h * 0.5

    tl_x = jnp.maximum(p_x - p_hw, t_x - t_hw)
    tl_y = jnp.maximum(p_y - p_hh, t_y - t_hh)
    br_x = jnp.minimum(p_x + p_hw, t_x + t_hw)
    br_y = jnp.minimum(p_y + p_hh, t_y + t_hh)

    area_p = p_w * p_h
    area_g = t_w * t_h

    en = jnp.logical_and(tl_x < br_x, tl_y < br_y).astype(jnp.float32)
    area_i = (br_x - tl_x) * (br_y - tl_y) * en
    area_u = area_p + area_g - area_i
    iou = area_i / (area_u + 1e-16)

    if loss_type == "iou":
        loss = 1.0 - iou * iou
    elif loss_type == "giou":
        c_tl_x = jnp.minimum(p_x - p_hw, t_x - t_hw)
        c_tl_y = jnp.minimum(p_y - p_hh, t_y - t_hh)
        c_br_x = jnp.maximum(p_x + p_hw, t_x + t_hw)
        c_br_y = jnp.maximum(p_y + p_hh, t_y + t_hh)
        area_c = (c_br_x - c_tl_x) * (c_br_y - c_tl_y)
        giou = iou - (area_c - area_u) / jnp.maximum(area_c, 1e-16)
        loss = 1.0 - jnp.clip(giou, -1.0, 1.0)
    else:
        raise ValueError(f"unknown loss_type: {loss_type}")

    out_ref[...] = loss


@functools.partial(jax.jit, static_argnames=("reduction", "loss_type"))
def iou_loss(pred, target, *, reduction="none", loss_type="iou"):
    """Pallas implementation of YOLOX IOUloss.forward."""
    assert pred.shape[0] == target.shape[0]
    pred = jnp.reshape(pred, (-1, 4)).astype(jnp.float32)
    target = jnp.reshape(target, (-1, 4)).astype(jnp.float32)
    n = pred.shape[0]

    rows = pl.cdiv(n, _LANES)
    # Small inputs: one grid step over the full (unpadded-in-rows) array.
    # Large inputs: fixed row_block so the rows axis pads to a multiple of it
    # (<= ~2 MiB of extra traffic, negligible at that size) and the grid axis
    # stays "parallel" so v7x shards the steps across its 2 TensorCores.
    row_block = rows if rows <= _MAX_ROW_BLOCK else _MAX_ROW_BLOCK
    rows_pad = pl.cdiv(rows, row_block) * row_block
    n_pad = rows_pad * _LANES

    # Single fused XLA pass (under jit): pad tail boxes + transpose to
    # coord-major + reshape so box index is (sublane, lane) dense.
    def to_slab(x):
        x = jnp.pad(x, ((0, n_pad - n), (0, 0)))
        return jnp.reshape(x.T, (4, rows_pad, _LANES))

    pred_s = to_slab(pred)
    targ_s = to_slab(target)

    kernel = functools.partial(_iou_loss_kernel, loss_type=loss_type)

    out = pl.pallas_call(
        kernel,
        out_shape=jax.ShapeDtypeStruct((rows_pad, _LANES), jnp.float32),
        grid_spec=pltpu.PrefetchScalarGridSpec(
            num_scalar_prefetch=0,
            grid=(rows_pad // row_block,),
            in_specs=[
                pl.BlockSpec((4, row_block, _LANES), lambda i: (0, i, 0)),
                pl.BlockSpec((4, row_block, _LANES), lambda i: (0, i, 0)),
            ],
            out_specs=pl.BlockSpec((row_block, _LANES), lambda i: (i, 0)),
        ),
        compiler_params=pltpu.CompilerParams(
            dimension_semantics=("parallel",)),
    )(pred_s, targ_s)

    loss = jnp.reshape(out, (n_pad,))[:n]          # (N,)

    # Reduction (glue, outside the hot path).
    if reduction == "mean":
        loss = jnp.mean(loss)
    elif reduction == "sum":
        loss = jnp.sum(loss)
    return loss


def _reference_iou_loss(pred, target, reduction="none", loss_type="iou"):
    pred = jnp.reshape(pred, (-1, 4)).astype(jnp.float32)
    target = jnp.reshape(target, (-1, 4)).astype(jnp.float32)
    tl = jnp.maximum(pred[:, :2] - pred[:, 2:] / 2, target[:, :2] - target[:, 2:] / 2)
    br = jnp.minimum(pred[:, :2] + pred[:, 2:] / 2, target[:, :2] + target[:, 2:] / 2)
    area_p = jnp.prod(pred[:, 2:], axis=1)
    area_g = jnp.prod(target[:, 2:], axis=1)
    en = jnp.prod((tl < br).astype(tl.dtype), axis=1)
    area_i = jnp.prod(br - tl, axis=1) * en
    area_u = area_p + area_g - area_i
    iou = area_i / (area_u + 1e-16)
    if loss_type == "iou":
        loss = 1 - iou ** 2
    else:
        c_tl = jnp.minimum(pred[:, :2] - pred[:, 2:] / 2, target[:, :2] - target[:, 2:] / 2)
        c_br = jnp.maximum(pred[:, :2] + pred[:, 2:] / 2, target[:, :2] + target[:, 2:] / 2)
        area_c = jnp.prod(c_br - c_tl, axis=1)
        giou = iou - (area_c - area_u) / jnp.maximum(area_c, 1e-16)
        loss = 1 - jnp.clip(giou, -1.0, 1.0)
    if reduction == "mean":
        loss = jnp.mean(loss)
    elif reduction == "sum":
        loss = jnp.sum(loss)
    return loss


if __name__ == "__main__":
    # Small deterministic inputs: 2 images x 100 boxes, 4 coords (cx, cy, w, h).
    key = jax.random.PRNGKey(0)
    k1, k2 = jax.random.split(key)
    pred = jax.random.uniform(k1, (2, 100, 4), dtype=jnp.float32)
    target = jax.random.uniform(k2, (2, 100, 4), dtype=jnp.float32)

    # Default module config: reduction='none', loss_type='iou'.
    loss = iou_loss(pred, target, reduction="none", loss_type="iou")
    loss = jax.block_until_ready(loss)

    ref = _reference_iou_loss(pred, target, reduction="none", loss_type="iou")
    assert loss.shape == (200,)
    assert jnp.allclose(loss, ref, atol=1e-5, rtol=1e-5)

    # Also exercise 'giou' + 'mean' path once.
    g = jax.block_until_ready(iou_loss(pred, target, reduction="mean", loss_type="giou"))
    g_ref = _reference_iou_loss(pred, target, reduction="mean", loss_type="giou")
    assert jnp.allclose(g, g_ref, atol=1e-5, rtol=1e-5)

    print("KERNEL_OK")
</pallas_src>

<mosaic_0001>
module attributes {stable_mosaic.version = 11 : i64} {
  func.func @_iou_loss_kernel(%arg0: i32, %arg1: memref<4x2x128xf32, #tpu.memory_space<vmem>>, %arg2: memref<4x2x128xf32, #tpu.memory_space<vmem>>, %arg3: memref<2x128xf32, #tpu.memory_space<vmem>>) attributes {dimension_semantics = [#tpu.dimension_semantics<parallel>], iteration_bounds = array<i64: 1>, scalar_prefetch = 0 : i64, scratch_operands = 0 : i64, tpu.core_type = #tpu.core_type<tc>, window_params = [{transform_indices = @transform_0, window_bounds = array<i64: 4, 2, 128>}, {transform_indices = @transform_1, window_bounds = array<i64: 4, 2, 128>}, {transform_indices = @transform_2, window_bounds = array<i64: 2, 128>}]} {
    %c0 = arith.constant 0 : index
    %c0_0 = arith.constant 0 : index
    %c0_1 = arith.constant 0 : index
    %0 = vector.load %arg1[%c0, %c0_0, %c0_1] : memref<4x2x128xf32, #tpu.memory_space<vmem>>, vector<1x2x128xf32>
    %1 = vector.shape_cast %0 : vector<1x2x128xf32> to vector<2x128xf32>
    %c1 = arith.constant 1 : index
    %c0_2 = arith.constant 0 : index
    %c0_3 = arith.constant 0 : index
    %2 = vector.load %arg1[%c1, %c0_2, %c0_3] : memref<4x2x128xf32, #tpu.memory_space<vmem>>, vector<1x2x128xf32>
    %3 = vector.shape_cast %2 : vector<1x2x128xf32> to vector<2x128xf32>
    %c2 = arith.constant 2 : index
    %c0_4 = arith.constant 0 : index
    %c0_5 = arith.constant 0 : index
    %4 = vector.load %arg1[%c2, %c0_4, %c0_5] : memref<4x2x128xf32, #tpu.memory_space<vmem>>, vector<1x2x128xf32>
    %5 = vector.shape_cast %4 : vector<1x2x128xf32> to vector<2x128xf32>
    %c3 = arith.constant 3 : index
    %c0_6 = arith.constant 0 : index
    %c0_7 = arith.constant 0 : index
    %6 = vector.load %arg1[%c3, %c0_6, %c0_7] : memref<4x2x128xf32, #tpu.memory_space<vmem>>, vector<1x2x128xf32>
    %7 = vector.shape_cast %6 : vector<1x2x128xf32> to vector<2x128xf32>
    %c0_8 = arith.constant 0 : index
    %c0_9 = arith.constant 0 : index
    %c0_10 = arith.constant 0 : index
    %8 = vector.load %arg2[%c0_8, %c0_9, %c0_10] : memref<4x2x128xf32, #tpu.memory_space<vmem>>, vector<1x2x128xf32>
    %9 = vector.shape_cast %8 : vector<1x2x128xf32> to vector<2x128xf32>
    %c1_11 = arith.constant 1 : index
    %c0_12 = arith.constant 0 : index
    %c0_13 = arith.constant 0 : index
    %10 = vector.load %arg2[%c1_11, %c0_12, %c0_13] : memref<4x2x128xf32, #tpu.memory_space<vmem>>, vector<1x2x128xf32>
    %11 = vector.shape_cast %10 : vector<1x2x128xf32> to vector<2x128xf32>
    %c2_14 = arith.constant 2 : index
    %c0_15 = arith.constant 0 : index
    %c0_16 = arith.constant 0 : index
    %12 = vector.load %arg2[%c2_14, %c0_15, %c0_16] : memref<4x2x128xf32, #tpu.memory_space<vmem>>, vector<1x2x128xf32>
    %13 = vector.shape_cast %12 : vector<1x2x128xf32> to vector<2x128xf32>
    %c3_17 = arith.constant 3 : index
    %c0_18 = arith.constant 0 : index
    %c0_19 = arith.constant 0 : index
    %14 = vector.load %arg2[%c3_17, %c0_18, %c0_19] : memref<4x2x128xf32, #tpu.memory_space<vmem>>, vector<1x2x128xf32>
    %15 = vector.shape_cast %14 : vector<1x2x128xf32> to vector<2x128xf32>
    %cst = arith.constant 5.000000e-01 : f32
    %16 = vector.broadcast %cst : f32 to vector<2x128xf32>
    %17 = arith.mulf %5, %16 : vector<2x128xf32>
    %cst_20 = arith.constant 5.000000e-01 : f32
    %18 = vector.broadcast %cst_20 : f32 to vector<2x128xf32>
    %19 = arith.mulf %7, %18 : vector<2x128xf32>
    %cst_21 = arith.constant 5.000000e-01 : f32
    %20 = vector.broadcast %cst_21 : f32 to vector<2x128xf32>
    %21 = arith.mulf %13, %20 : vector<2x128xf32>
    %cst_22 = arith.constant 5.000000e-01 : f32
    %22 = vector.broadcast %cst_22 : f32 to vector<2x128xf32>
    %23 = arith.mulf %15, %22 : vector<2x128xf32>
    %24 = arith.subf %1, %17 : vector<2x128xf32>
    %25 = arith.subf %9, %21 : vector<2x128xf32>
    %26 = arith.maximumf %24, %25 : vector<2x128xf32>
    %27 = arith.subf %3, %19 : vector<2x128xf32>
    %28 = arith.subf %11, %23 : vector<2x128xf32>
    %29 = arith.maximumf %27, %28 : vector<2x128xf32>
    %30 = arith.addf %1, %17 : vector<2x128xf32>
    %31 = arith.addf %9, %21 : vector<2x128xf32>
    %32 = arith.minimumf %30, %31 : vector<2x128xf32>
    %33 = arith.addf %3, %19 : vector<2x128xf32>
    %34 = arith.addf %11, %23 : vector<2x128xf32>
    %35 = arith.minimumf %33, %34 : vector<2x128xf32>
    %36 = arith.mulf %5, %7 : vector<2x128xf32>
    %37 = arith.mulf %13, %15 : vector<2x128xf32>
    %38 = arith.cmpf olt, %26, %32 : vector<2x128xf32>
    %39 = arith.cmpf olt, %29, %35 : vector<2x128xf32>
    %40 = arith.andi %38, %39 : vector<2x128xi1>
    %41 = arith.extui %40 : vector<2x128xi1> to vector<2x128xi32>
    %42 = arith.sitofp %41 : vector<2x128xi32> to vector<2x128xf32>
    %43 = arith.subf %32, %26 : vector<2x128xf32>
    %44 = arith.subf %35, %29 : vector<2x128xf32>
    %45 = arith.mulf %43, %44 : vector<2x128xf32>
    %46 = arith.mulf %45, %42 : vector<2x128xf32>
    %47 = arith.addf %36, %37 : vector<2x128xf32>
    %48 = arith.subf %47, %46 : vector<2x128xf32>
    %cst_23 = arith.constant 1.000000e-16 : f32
    %49 = vector.broadcast %cst_23 : f32 to vector<2x128xf32>
    %50 = arith.addf %48, %49 : vector<2x128xf32>
    %51 = arith.divf %46, %50 : vector<2x128xf32>
    %52 = arith.mulf %51, %51 : vector<2x128xf32>
    %cst_24 = arith.constant 1.000000e+00 : f32
    %53 = vector.broadcast %cst_24 : f32 to vector<2x128xf32>
    %54 = arith.subf %53, %52 : vector<2x128xf32>
    %c0_25 = arith.constant 0 : index
    %c0_26 = arith.constant 0 : index
    %55 = vector.load %arg3[%c0_25, %c0_26] : memref<2x128xf32, #tpu.memory_space<vmem>>, vector<2x128xf32>
    tpu.vector_store %arg3[%c0_25, %c0_26], %54 {strides = array<i32>} : memref<2x128xf32, #tpu.memory_space<vmem>>, vector<2x128xf32>,
    return
  }
  func.func @transform_0(%arg0: i32) -> (i32, i32, i32) {
    %c0_i32 = arith.constant 0 : i32
    %c0_i32_0 = arith.constant 0 : i32
    %c0_i32_1 = arith.constant 0 : i32
    return %c0_i32, %arg0, %c0_i32_0 : i32, i32, i32
  }
  func.func @transform_1(%arg0: i32) -> (i32, i32, i32) {
    %c0_i32 = arith.constant 0 : i32
    %c0_i32_0 = arith.constant 0 : i32
    %c0_i32_1 = arith.constant 0 : i32
    return %c0_i32, %arg0, %c0_i32_0 : i32, i32, i32
  }
  func.func @transform_2(%arg0: i32) -> (i32, i32) {
    %c0_i32 = arith.constant 0 : i32
    %c0_i32_0 = arith.constant 0 : i32
    return %arg0, %c0_i32 : i32, i32
  }
}

</mosaic_0001>

<bundles_post_ra>
// kernel: iou_loss.1
= control target key start
LH: loop header
LB: loop body
LE: loop exit
PB: predicated region body
PF: predicated region fallthrough
CT: control target
= control target key end

     0   :  { %s163_s0 = inlined_call_operand.vmem [shape: f32[4,2,128], index: 0, kind: input, shape index: {}]   ;;  %s164_s1 = inlined_call_operand.vmem [shape: f32[4,2,128], index: 1, kind: input, shape index: {}]   ;;  %s165_s2 = inlined_call_operand.hbm [shape: f32[2,128], index: 2, kind: output, shape index: {}]  }
   0x1   :  { %v12_v0 = vld [vmem:[%s163_s0] sm:$0x3]  ;;  %v75_v1 = vld [vmem:[%s163_s0 + $0x2] sm:$0x3]  ;;  %v76_v2 = vld [vmem:[%s163_s0 + $0x4] sm:$0x3] }
   0x2   :  { %v77_v3 = vld [vmem:[%s163_s0 + $0x6] sm:$0x3]  ;;  %v19_v4 = vld [vmem:[%s164_s1] sm:$0x3]  ;;  %v78_v5 = vld [vmem:[%s164_s1 + $0x2] sm:$0x3] }
   0x3   :  { %v79_v6 = vld [vmem:[%s164_s1 + $0x4] sm:$0x3]  ;;  %v80_v7 = vld [vmem:[%s164_s1 + $0x6] sm:$0x3]  ;;  %v26_v8 = vmul.f32 0.5, %v76_v2  ;;  %v27_v9 = vmul.f32 0.5, %v77_v3 }
   0x4   :  { %v28_v10 = vmul.f32 0.5, %v79_v6  ;;  %v29_v11 = vmul.f32 0.5, %v80_v7 }
   0x5   :  { %7 = vsyncpa [#allocation3], 0  ;;  %v30_v12 = vsub.f32 %v12_v0, %v26_v8  ;;  %v33_v13 = vsub.f32 %v75_v1, %v27_v9  ;;  %v36_v14 = vadd.f32 %v26_v8, %v12_v0  ;;  %v39_v15 = vadd.f32 %v75_v1, %v27_v9  ;;  %s111_s0 = smov [#allocation2]  }
   0x6   :  { %v31_v16 = vsub.f32 %v19_v4, %v28_v10  ;;  %v34_v17 = vsub.f32 %v78_v5, %v29_v11  ;;  %v37_v18 = vadd.f32 %v28_v10, %v19_v4  ;;  %v40_v19 = vadd.f32 %v78_v5, %v29_v11  ;;  %s67_s1 = sshll.u32 %s111_s0, 4  ;;  %s68_s1 = int_to_ptr.vmem [resolvable:$true] %s67_s1 }
   0x7   :  { %v42_v20 = vmul.f32 %v77_v3, %v76_v2  ;;  %v43_v21 = vmul.f32 %v80_v7, %v79_v6  ;;  %v110_v28 = vmov 0.0   ;;  %s86_s25 = scalar_lea.vmem %s68_s1, 32  ;;  %p91_p1 = scmp.lt.s32.totalorder %s68_s1, %s68_s1 }
   0x8   :  { %v32_v22 = vmax.f32 %v30_v12, %v31_v16  ;;  %v35_v23 = vmax.f32 %v33_v13, %v34_v17  ;;  %v38_v24 = vmin.f32 %v36_v14, %v37_v18  ;;  %v41_v25 = vmin.f32 %v39_v15, %v40_v19  ;;  %p87_p0 = scmp.ne.s32.totalorder %s68_s1, %s86_s25  ;;  %p92_p2 = scmp.lt.s32.totalorder %s86_s25, %s86_s25 }
   0x9   :  { %v53_v31 = vadd.f32 %v43_v21, %v42_v20 }
   0xa   :  { %vm44_vm0 = vcmp.lt.f32.partialorder %v32_v22, %v38_v24  ;;  %vm45_vm1 = vcmp.lt.f32.partialorder %v35_v23, %v41_v25  ;;  %v49_v26 = vsub.f32 %v38_v24, %v32_v22  ;;  %v50_v27 = vsub.f32 %v41_v25, %v35_v23  ;;  %p93_p3 = por %p92_p2, %p91_p1 }
   0xb   :  { %vm46_vm2 = vmand %vm44_vm0, %vm45_vm1 }
   0xc   :  { %v81_v29 = vsel %vm46_vm2, 1.0, %v110_v28  ;;  %v51_v30 = vmul.f32 %v50_v27, %v49_v26  ;;  %p94_p4 = pnand %p93_p3, %p87_p0 }
   0xe   :  { %v52_v32 = vmul.f32 %v81_v29, %v51_v30 }
  0x10   :  { %v54_v33 = vsub.f32 %v53_v31, %v52_v32 }
  0x12   :  { %v55_v34 = vadd.f32 1e-16, %v54_v33 }
  0x14   :  { %84 = vrcp.f32 %v55_v34 }
  0x1e   :  { %v85_v35 = vpop.eup %84 }
  0x1f   :  { %v57_v36 = vmul.f32 %v85_v35, %v52_v32 }
  0x21   :  { %v58_v37 = vmul.f32 %v57_v36, %v57_v36 }
  0x23   :  { %v59_v38 = vsub.f32 1.0, %v58_v37 }
  0x25   :  { %60 = vst [vmem:[#allocation2] sm:$0x3] %v59_v38 }
  0x26   :  { %97 = shalt.err (!%p94_p4)
}
  0x27   :  { %s98_s28 = scalar_lea.hbm %s165_s2, 32 }
  0x28   :  { %p99_p5 = scmp.ne.s32.totalorder %s165_s2, %s98_s28  ;;  %p102_p6 = scmp.lt.u32.totalorder %s98_s28, %s165_s2 }
  0x2a   :  { %p104_p7 = pnand %p102_p6, %p99_p5 }
  0x2c   :  { %107 = shalt.err (!%p104_p7)
}
  0x2d   :  { %70 = dma.vmem_to_hbm [thread:$0]  %s68_s1, 32, %s165_s2, [#allocation3]  }
  0x2e   :  { %108 = dma.done.wait [#allocation3], 32  }
  0x2f   :  { %109 = vsyncadd [#allocation3], 4294967264 }
  0x30   :  { %74 = vsyncpa [#allocation3], 1 }

</bundles_post_ra>
